<compile_context>
chip_gen: v7x
topology: tpu7x:2x2x1
jax: 0.10.0
libtpu: 0.0.40
codegen_flags: <defaults>
</compile_context>

<pallas_src>
import functools

import numpy as np
import jax
import jax.numpy as jnp
from jax.experimental import pallas as pl
from jax.experimental.pallas import tpu as pltpu


def _rse_kernel(x_ref, mask_ref, wm_ref, w1t_ref, b1_ref, w2t_ref, b2_ref,
                o_ref, *, K, H, W, N, shortcut, mm_dtype):
    """Fused conv(KxK, same, no bias) + SE + shortcut for all N batch elements."""
    HW = H * W
    NHW = N * HW
    p = K // 2
    inv_hw = 1.0 / float(HW)

    # Batch-invariant operands.
    wm = wm_ref[...].astype(mm_dtype)            # (Cout, K*K*Cin) im2col weight
    w1t = w1t_ref[...].astype(jnp.float32)       # (Cred, Cout)
    b1 = b1_ref[...].astype(jnp.float32)         # (Cred, 1)
    w2t = w2t_ref[...].astype(jnp.float32)       # (Cout, Cred)
    b2 = b2_ref[...].astype(jnp.float32)         # (Cout, 1)
    mask = mask_ref[...]                         # (K*K*Cin, N*HW) f32 halo mask

    # Fold the batch onto the lane axis: (Cin, N*HW).  Each piece is 256 lanes
    # (multiple of 128), so this is a lane-aligned copy, no relayout.
    x_slab = jnp.concatenate(
        [x_ref[n].astype(jnp.float32) for n in range(N)], axis=1)

    # One XLU roll per conv tap over the whole concatenated slab.  Lanes whose
    # rolled source crossed a batch segment boundary are exactly the halo
    # lanes that the mask zeroes (asserted host-side in _make_halo_mask).
    taps = []
    for ky in range(K):
        for kx in range(K):
            off = (ky - p) * W + (kx - p)
            shift = (-off) % NHW
            taps.append(x_slab if shift == 0
                        else pltpu.roll(x_slab, shift=shift, axis=1))

    # Single im2col slab + single full-block mask multiply (f32 VPU).
    patches = jnp.concatenate(taps, axis=0) * mask        # (K*K*Cin, N*HW)

    # Whole conv, all batches, as ONE MXU matmul -> (Cout, N*HW) f32.
    acc = jnp.dot(wm, patches.astype(mm_dtype),
                  preferred_element_type=jnp.float32)

    # --- SE block, batched across N ---------------------------------------
    # Global average pool: per-batch lane reduction (XLU), assembled into
    # (Cout, N) so the two FC layers are a single matmul each.
    pooled = jnp.concatenate(
        [jnp.sum(acc[:, n * HW:(n + 1) * HW], axis=1, keepdims=True)
         for n in range(N)], axis=1) * inv_hw             # (Cout, N)
    z1 = jnp.dot(w1t, pooled, preferred_element_type=jnp.float32) + b1
    z1 = jnp.maximum(z1, 0.0)                             # ReLU        (Cred, N)
    z2 = jnp.dot(w2t, z1, preferred_element_type=jnp.float32) + b2      # (Cout, N)
    s = jnp.clip(z2 * (1.0 / 6.0) + 0.5, 0.0, 1.0)        # hardsigmoid (Cout, N)

    # shortcut: acc + acc*s == acc*(1+s)  (one VPU multiply, no extra add).
    scale = (1.0 + s) if shortcut else s                  # (Cout, N)

    # Lane-aligned per-batch stores: each is a full (Cout=8, HW=256) unmasked vst.
    for n in range(N):
        o_ref[n] = (acc[:, n * HW:(n + 1) * HW]
                    * scale[:, n:n + 1]).astype(o_ref.dtype)


def _make_halo_mask(H, W, K, Cin, N):
    """Host-side 0/1 halo mask over the batch-concatenated im2col slab.

    Returns (K*K*Cin, N*HW) float32, row order (ky, kx, cin) matching the
    im2col weight layout, tiled identically for every batch segment.
    """
    p = K // 2
    HW = H * W
    ys, xs = np.meshgrid(np.arange(H), np.arange(W), indexing="ij")
    ys = ys.reshape(-1)
    xs = xs.reshape(-1)
    rows = []
    for ky in range(K):
        for kx in range(K):
            dy, dx = ky - p, kx - p
            valid = ((ys + dy >= 0) & (ys + dy < H) &
                     (xs + dx >= 0) & (xs + dx < W))
            # The same roll is applied to the whole batch-concatenated slab:
            # any lane whose rolled source would land in a different batch
            # segment MUST be a masked halo lane.  Verify.
            src = ys * W + xs + dy * W + dx
            crosses = (src < 0) | (src >= HW)
            assert not np.any(crosses & valid), \
                "cross-batch wrap would hit an unmasked lane"
            rows.append(valid.astype(np.float32))
    tap_mask = np.stack(rows, axis=0)              # (K*K, HW)
    full = np.repeat(tap_mask, Cin, axis=0)        # (K*K*Cin, HW) - (ky,kx,cin) rows
    return np.tile(full, (1, N))                   # (K*K*Cin, N*HW)


def rse_layer(x_nchw, conv_w_oihw, w1, b1, w2, b2, *, shortcut=True,
              mm_dtype=jnp.float32):
    """RSELayer forward.  x_nchw: (N, Cin, H, W).  Returns (N, Cout, H, W).

    mm_dtype: dtype of the conv-matmul operands.  Use jnp.bfloat16 on v6e/v7x
    for the native MXU path (accumulation stays f32); elementwise work stays f32.
    """
    N, Cin, H, W = x_nchw.shape
    Cout, Cin_w, K, K2 = conv_w_oihw.shape
    assert Cin_w == Cin and K == K2
    assert K % 2 == 1, "only odd kernel_size ('same' padding = K//2) is supported"
    Cred = w1.shape[1]
    HW = H * W

    # Free reshapes only on the activations; no pad / transpose HBM passes.
    x_flat = x_nchw.reshape(N, Cin, HW)
    # im2col-ordered conv weight: rows = Cout, cols ordered (ky, kx, Cin).
    wm = jnp.transpose(conv_w_oihw, (0, 2, 3, 1)).reshape(Cout, K * K * Cin)
    w1t = jnp.transpose(w1)                      # (Cred, Cout)
    w2t = jnp.transpose(w2)                      # (Cout, Cred)
    b1c = b1.reshape(Cred, 1)
    b2c = b2.reshape(Cout, 1)
    mask = jnp.asarray(_make_halo_mask(H, W, K, Cin, N))   # (K*K*Cin, N*HW)

    kernel = functools.partial(_rse_kernel, K=K, H=H, W=W, N=N,
                               shortcut=shortcut, mm_dtype=mm_dtype)

    out_flat = pl.pallas_call(
        kernel,
        out_shape=jax.ShapeDtypeStruct((N, Cout, HW), x_nchw.dtype),
        grid=(1,),                               # whole (tiny) problem in one step
        in_specs=[
            pl.BlockSpec((N, Cin, HW), lambda i: (0, 0, 0)),
            pl.BlockSpec((K * K * Cin, N * HW), lambda i: (0, 0)),
            pl.BlockSpec((Cout, K * K * Cin), lambda i: (0, 0)),
            pl.BlockSpec((Cred, Cout), lambda i: (0, 0)),
            pl.BlockSpec((Cred, 1), lambda i: (0, 0)),
            pl.BlockSpec((Cout, Cred), lambda i: (0, 0)),
            pl.BlockSpec((Cout, 1), lambda i: (0, 0)),
        ],
        out_specs=pl.BlockSpec((N, Cout, HW), lambda i: (0, 0, 0)),
        compiler_params=pltpu.CompilerParams(dimension_semantics=("arbitrary",)),
    )(x_flat, mask, wm, w1t, b1c, w2t, b2c)

    return out_flat.reshape(N, Cout, H, W)       # free reshape back to NCHW


def rse_layer_reference(x_nchw, conv_w_oihw, w1, b1, w2, b2, *, shortcut=True):
    """Pure-JAX reference for validation."""
    K = conv_w_oihw.shape[2]
    p = K // 2
    conv = jax.lax.conv_general_dilated(
        x_nchw, conv_w_oihw, window_strides=(1, 1), padding=[(p, p), (p, p)],
        dimension_numbers=("NCHW", "OIHW", "NCHW"))
    y = jnp.mean(conv, axis=(2, 3))              # (N, Cout)
    z1 = jnp.maximum(y @ w1 + b1, 0.0)
    z2 = z1 @ w2 + b2
    s = jnp.clip(z2 / 6.0 + 0.5, 0.0, 1.0)
    se = conv * s[:, :, None, None]
    return conv + se if shortcut else se


if __name__ == "__main__":
    # Small shapes consistent with RSELayer(in_channels=4, out_channels=8, kernel_size=3)
    N, Cin, H, W = 2, 4, 16, 16
    Cout, K = 8, 3
    reduction = 4
    Cred = Cout // reduction

    key = jax.random.PRNGKey(0)
    kx, kw, k1, kb1, k2, kb2 = jax.random.split(key, 6)

    x = jax.random.normal(kx, (N, Cin, H, W), dtype=jnp.float32)
    conv_w = 0.1 * jax.random.normal(kw, (Cout, Cin, K, K), dtype=jnp.float32)   # OIHW
    w1 = 0.2 * jax.random.normal(k1, (Cout, Cred), dtype=jnp.float32)            # fc1 (1x1 conv)
    b1 = 0.1 * jax.random.normal(kb1, (Cred,), dtype=jnp.float32)
    w2 = 0.2 * jax.random.normal(k2, (Cred, Cout), dtype=jnp.float32)            # fc2 (1x1 conv)
    b2 = 0.1 * jax.random.normal(kb2, (Cout,), dtype=jnp.float32)

    ref = rse_layer_reference(x, conv_w, w1, b1, w2, b2, shortcut=True)

    # Exact (f32 MXU operand) path.
    out = jax.block_until_ready(rse_layer(x, conv_w, w1, b1, w2, b2, shortcut=True))
    assert out.shape == (N, Cout, H, W), out.shape
    assert jnp.allclose(out, ref, atol=1e-5, rtol=1e-5), \
        f"max abs err = {jnp.max(jnp.abs(out - ref))}"

    # Native-MXU (bf16 operand) path for v6e/v7x; looser tolerance.
    out_bf16 = jax.block_until_ready(
        rse_layer(x, conv_w, w1, b1, w2, b2, shortcut=True, mm_dtype=jnp.bfloat16))
    assert jnp.allclose(out_bf16, ref, atol=5e-2, rtol=5e-2), \
        f"bf16 max abs err = {jnp.max(jnp.abs(out_bf16 - ref))}"

    print("KERNEL_OK")
</pallas_src>

<mosaic_0001>
module attributes {stable_mosaic.version = 11 : i64} {
  func.func @_rse_kernel(%arg0: i32, %arg1: memref<2x4x256xf32, #tpu.memory_space<vmem>>, %arg2: memref<36x512xf32, #tpu.memory_space<vmem>>, %arg3: memref<8x36xf32, #tpu.memory_space<vmem>>, %arg4: memref<2x8xf32, #tpu.memory_space<vmem>>, %arg5: memref<2x1xf32, #tpu.memory_space<vmem>>, %arg6: memref<8x2xf32, #tpu.memory_space<vmem>>, %arg7: memref<8x1xf32, #tpu.memory_space<vmem>>, %arg8: memref<2x8x256xf32, #tpu.memory_space<vmem>>) attributes {dimension_semantics = [#tpu.dimension_semantics<arbitrary>], iteration_bounds = array<i64: 1>, scalar_prefetch = 0 : i64, scratch_operands = 0 : i64, tpu.core_type = #tpu.core_type<tc>, window_params = [{pipeline_mode = #tpu.pipeline_mode<synchronous>, transform_indices = @transform_0, window_bounds = array<i64: 2, 4, 256>}, {pipeline_mode = #tpu.pipeline_mode<synchronous>, transform_indices = @transform_1, window_bounds = array<i64: 36, 512>}, {pipeline_mode = #tpu.pipeline_mode<synchronous>, transform_indices = @transform_2, window_bounds = array<i64: 8, 36>}, {pipeline_mode = #tpu.pipeline_mode<synchronous>, transform_indices = @transform_3, window_bounds = array<i64: 2, 8>}, {pipeline_mode = #tpu.pipeline_mode<synchronous>, transform_indices = @transform_4, window_bounds = array<i64: 2, 1>}, {pipeline_mode = #tpu.pipeline_mode<synchronous>, transform_indices = @transform_5, window_bounds = array<i64: 8, 2>}, {pipeline_mode = #tpu.pipeline_mode<synchronous>, transform_indices = @transform_6, window_bounds = array<i64: 8, 1>}, {pipeline_mode = #tpu.pipeline_mode<synchronous>, transform_indices = @transform_7, window_bounds = array<i64: 2, 8, 256>}]} {
    %c0 = arith.constant 0 : index
    %c0_0 = arith.constant 0 : index
    %0 = vector.load %arg3[%c0, %c0_0] : memref<8x36xf32, #tpu.memory_space<vmem>>, vector<8x36xf32>
    %c0_1 = arith.constant 0 : index
    %c0_2 = arith.constant 0 : index
    %1 = vector.load %arg4[%c0_1, %c0_2] : memref<2x8xf32, #tpu.memory_space<vmem>>, vector<2x8xf32>
    %c0_3 = arith.constant 0 : index
    %c0_4 = arith.constant 0 : index
    %2 = vector.load %arg5[%c0_3, %c0_4] : memref<2x1xf32, #tpu.memory_space<vmem>>, vector<2x1xf32>
    %c0_5 = arith.constant 0 : index
    %c0_6 = arith.constant 0 : index
    %3 = vector.load %arg6[%c0_5, %c0_6] : memref<8x2xf32, #tpu.memory_space<vmem>>, vector<8x2xf32>
    %c0_7 = arith.constant 0 : index
    %c0_8 = arith.constant 0 : index
    %4 = vector.load %arg7[%c0_7, %c0_8] : memref<8x1xf32, #tpu.memory_space<vmem>>, vector<8x1xf32>
    %c0_9 = arith.constant 0 : index
    %c0_10 = arith.constant 0 : index
    %5 = vector.load %arg2[%c0_9, %c0_10] : memref<36x512xf32, #tpu.memory_space<vmem>>, vector<36x512xf32>
    %c0_11 = arith.constant 0 : index
    %c0_12 = arith.constant 0 : index
    %c0_13 = arith.constant 0 : index
    %6 = vector.load %arg1[%c0_11, %c0_12, %c0_13] : memref<2x4x256xf32, #tpu.memory_space<vmem>>, vector<1x4x256xf32>
    %7 = vector.shape_cast %6 : vector<1x4x256xf32> to vector<4x256xf32>
    %c1 = arith.constant 1 : index
    %c0_14 = arith.constant 0 : index
    %c0_15 = arith.constant 0 : index
    %8 = vector.load %arg1[%c1, %c0_14, %c0_15] : memref<2x4x256xf32, #tpu.memory_space<vmem>>, vector<1x4x256xf32>
    %9 = vector.shape_cast %8 : vector<1x4x256xf32> to vector<4x256xf32>
    %10 = tpu.concatenate %7, %9 in 1 : vector<4x256xf32>, vector<4x256xf32> -> vector<4x512xf32>
    %c17_i32 = arith.constant 17 : i32
    %11 = tpu.dynamic_rotate %10 by %c17_i32 dim 1 : vector<4x512xf32>, i32 -> vector<4x512xf32>
    %c16_i32 = arith.constant 16 : i32
    %12 = tpu.dynamic_rotate %10 by %c16_i32 dim 1 : vector<4x512xf32>, i32 -> vector<4x512xf32>
    %c15_i32 = arith.constant 15 : i32
    %13 = tpu.dynamic_rotate %10 by %c15_i32 dim 1 : vector<4x512xf32>, i32 -> vector<4x512xf32>
    %c1_i32 = arith.constant 1 : i32
    %14 = tpu.dynamic_rotate %10 by %c1_i32 dim 1 : vector<4x512xf32>, i32 -> vector<4x512xf32>
    %c511_i32 = arith.constant 511 : i32
    %15 = tpu.dynamic_rotate %10 by %c511_i32 dim 1 : vector<4x512xf32>, i32 -> vector<4x512xf32>
    %c497_i32 = arith.constant 497 : i32
    %16 = tpu.dynamic_rotate %10 by %c497_i32 dim 1 : vector<4x512xf32>, i32 -> vector<4x512xf32>
    %c496_i32 = arith.constant 496 : i32
    %17 = tpu.dynamic_rotate %10 by %c496_i32 dim 1 : vector<4x512xf32>, i32 -> vector<4x512xf32>
    %c495_i32 = arith.constant 495 : i32
    %18 = tpu.dynamic_rotate %10 by %c495_i32 dim 1 : vector<4x512xf32>, i32 -> vector<4x512xf32>
    %19 = tpu.concatenate %11, %12, %13, %14, %10, %15, %16, %17, %18 in 0 : vector<4x512xf32>, vector<4x512xf32>, vector<4x512xf32>, vector<4x512xf32>, vector<4x512xf32>, vector<4x512xf32>, vector<4x512xf32>, vector<4x512xf32>, vector<4x512xf32> -> vector<36x512xf32>
    %20 = arith.mulf %19, %5 : vector<36x512xf32>
    %cst = arith.constant dense<0.000000e+00> : vector<8x512xf32>
    %21 = tpu.matmul %0, %20, %cst {dimension_numbers = #tpu.dot_dimension_numbers<[1], [0], [0], [1], [0, 0, 1, 1], [], []>} : vector<8x36xf32>, vector<36x512xf32>, vector<8x512xf32> -> vector<8x512xf32>
    %22 = vector.extract_strided_slice %21 {offsets = [0, 0], sizes = [8, 256], strides = [1, 1]} : vector<8x512xf32> to vector<8x256xf32>
    %cst_16 = arith.constant dense<0.000000e+00> : vector<8xf32>
    %23 = vector.multi_reduction <add>, %22, %cst_16 [1] : vector<8x256xf32> to vector<8xf32>
    %24 = vector.shape_cast %23 : vector<8xf32> to vector<8x1xf32>
    %25 = vector.extract_strided_slice %21 {offsets = [0, 256], sizes = [8, 256], strides = [1, 1]} : vector<8x512xf32> to vector<8x256xf32>
    %cst_17 = arith.constant dense<0.000000e+00> : vector<8xf32>
    %26 = vector.multi_reduction <add>, %25, %cst_17 [1] : vector<8x256xf32> to vector<8xf32>
    %27 = vector.shape_cast %26 : vector<8xf32> to vector<8x1xf32>
    %28 = tpu.concatenate %24, %27 in 1 : vector<8x1xf32>, vector<8x1xf32> -> vector<8x2xf32>
    %cst_18 = arith.constant 3.906250e-03 : f32
    %29 = vector.broadcast %cst_18 : f32 to vector<8x2xf32>
    %30 = arith.mulf %28, %29 : vector<8x2xf32>
    %cst_19 = arith.constant dense<0.000000e+00> : vector<2x2xf32>
    %31 = tpu.matmul %1, %30, %cst_19 {dimension_numbers = #tpu.dot_dimension_numbers<[1], [0], [0], [1], [0, 0, 1, 1], [], []>} : vector<2x8xf32>, vector<8x2xf32>, vector<2x2xf32> -> vector<2x2xf32>
    %32 = vector.broadcast %2 : vector<2x1xf32> to vector<2x2xf32>
    %33 = arith.addf %31, %32 : vector<2x2xf32>
    %cst_20 = arith.constant 0.000000e+00 : f32
    %34 = vector.broadcast %cst_20 : f32 to vector<2x2xf32>
    %35 = arith.maximumf %33, %34 : vector<2x2xf32>
    %cst_21 = arith.constant dense<0.000000e+00> : vector<8x2xf32>
    %36 = tpu.matmul %3, %35, %cst_21 {dimension_numbers = #tpu.dot_dimension_numbers<[1], [0], [0], [1], [0, 0, 1, 1], [], []>} : vector<8x2xf32>, vector<2x2xf32>, vector<8x2xf32> -> vector<8x2xf32>
    %37 = vector.broadcast %4 : vector<8x1xf32> to vector<8x2xf32>
    %38 = arith.addf %36, %37 : vector<8x2xf32>
    %cst_22 = arith.constant 0.166666672 : f32
    %39 = vector.broadcast %cst_22 : f32 to vector<8x2xf32>
    %40 = arith.mulf %38, %39 : vector<8x2xf32>
    %cst_23 = arith.constant 5.000000e-01 : f32
    %41 = vector.broadcast %cst_23 : f32 to vector<8x2xf32>
    %42 = arith.addf %40, %41 : vector<8x2xf32>
    %cst_24 = arith.constant 0.000000e+00 : f32
    %cst_25 = arith.constant 1.000000e+00 : f32
    %43 = vector.broadcast %cst_24 : f32 to vector<8x2xf32>
    %44 = arith.maximumf %43, %42 : vector<8x2xf32>
    %45 = vector.broadcast %cst_25 : f32 to vector<8x2xf32>
    %46 = arith.minimumf %45, %44 : vector<8x2xf32>
    %cst_26 = arith.constant 1.000000e+00 : f32
    %47 = vector.broadcast %cst_26 : f32 to vector<8x2xf32>
    %48 = arith.addf %47, %46 : vector<8x2xf32>
    %49 = vector.extract_strided_slice %21 {offsets = [0, 0], sizes = [8, 256], strides = [1, 1]} : vector<8x512xf32> to vector<8x256xf32>
    %50 = vector.extract_strided_slice %48 {offsets = [0, 0], sizes = [8, 1], strides = [1, 1]} : vector<8x2xf32> to vector<8x1xf32>
    %51 = vector.broadcast %50 : vector<8x1xf32> to vector<8x256xf32>
    %52 = arith.mulf %49, %51 : vector<8x256xf32>
    %c0_27 = arith.constant 0 : index
    %c0_28 = arith.constant 0 : index
    %c0_29 = arith.constant 0 : index
    %53 = vector.load %arg8[%c0_27, %c0_28, %c0_29] : memref<2x8x256xf32, #tpu.memory_space<vmem>>, vector<1x8x256xf32>
    %54 = vector.shape_cast %53 : vector<1x8x256xf32> to vector<8x256xf32>
    %55 = vector.shape_cast %52 : vector<8x256xf32> to vector<1x8x256xf32>
    tpu.vector_store %arg8[%c0_27, %c0_28, %c0_29], %55 {strides = array<i32>} : memref<2x8x256xf32, #tpu.memory_space<vmem>>, vector<1x8x256xf32>,
    %56 = vector.extract_strided_slice %21 {offsets = [0, 256], sizes = [8, 256], strides = [1, 1]} : vector<8x512xf32> to vector<8x256xf32>
    %57 = vector.extract_strided_slice %48 {offsets = [0, 1], sizes = [8, 1], strides = [1, 1]} : vector<8x2xf32> to vector<8x1xf32>
    %58 = vector.broadcast %57 : vector<8x1xf32> to vector<8x256xf32>
    %59 = arith.mulf %56, %58 : vector<8x256xf32>
    %c1_30 = arith.constant 1 : index
    %c0_31 = arith.constant 0 : index
    %c0_32 = arith.constant 0 : index
    %60 = vector.load %arg8[%c1_30, %c0_31, %c0_32] : memref<2x8x256xf32, #tpu.memory_space<vmem>>, vector<1x8x256xf32>
    %61 = vector.shape_cast %60 : vector<1x8x256xf32> to vector<8x256xf32>
    %62 = vector.shape_cast %59 : vector<8x256xf32> to vector<1x8x256xf32>
    tpu.vector_store %arg8[%c1_30, %c0_31, %c0_32], %62 {strides = array<i32>} : memref<2x8x256xf32, #tpu.memory_space<vmem>>, vector<1x8x256xf32>,
    return
  }
  func.func @transform_0(%arg0: i32) -> (i32, i32, i32) {
    %c0_i32 = arith.constant 0 : i32
    %c0_i32_0 = arith.constant 0 : i32
    %c0_i32_1 = arith.constant 0 : i32
    %c0_i32_2 = arith.constant 0 : i32
    return %c0_i32, %c0_i32_0, %c0_i32_1 : i32, i32, i32
  }
  func.func @transform_1(%arg0: i32) -> (i32, i32) {
    %c0_i32 = arith.constant 0 : i32
    %c0_i32_0 = arith.constant 0 : i32
    %c0_i32_1 = arith.constant 0 : i32
    return %c0_i32, %c0_i32_0 : i32, i32
  }
  func.func @transform_2(%arg0: i32) -> (i32, i32) {
    %c0_i32 = arith.constant 0 : i32
    %c0_i32_0 = arith.constant 0 : i32
    %c0_i32_1 = arith.constant 0 : i32
    return %c0_i32, %c0_i32_0 : i32, i32
  }
  func.func @transform_3(%arg0: i32) -> (i32, i32) {
    %c0_i32 = arith.constant 0 : i32
    %c0_i32_0 = arith.constant 0 : i32
    %c0_i32_1 = arith.constant 0 : i32
    return %c0_i32, %c0_i32_0 : i32, i32
  }
  func.func @transform_4(%arg0: i32) -> (i32, i32) {
    %c0_i32 = arith.constant 0 : i32
    %c0_i32_0 = arith.constant 0 : i32
    %c0_i32_1 = arith.constant 0 : i32
    return %c0_i32, %c0_i32_0 : i32, i32
  }
  func.func @transform_5(%arg0: i32) -> (i32, i32) {
    %c0_i32 = arith.constant 0 : i32
    %c0_i32_0 = arith.constant 0 : i32
    %c0_i32_1 = arith.constant 0 : i32
    return %c0_i32, %c0_i32_0 : i32, i32
  }
  func.func @transform_6(%arg0: i32) -> (i32, i32) {
    %c0_i32 = arith.constant 0 : i32
    %c0_i32_0 = arith.constant 0 : i32
    %c0_i32_1 = arith.constant 0 : i32
    return %c0_i32, %c0_i32_0 : i32, i32
  }
  func.func @transform_7(%arg0: i32) -> (i32, i32, i32) {
    %c0_i32 = arith.constant 0 : i32
    %c0_i32_0 = arith.constant 0 : i32
    %c0_i32_1 = arith.constant 0 : i32
    %c0_i32_2 = arith.constant 0 : i32
    return %c0_i32, %c0_i32_0, %c0_i32_1 : i32, i32, i32
  }
}

</mosaic_0001>

<bundles_post_ra>
// kernel: tpu_custom_call.1
= control target key start
LH: loop header
LB: loop body
LE: loop exit
PB: predicated region body
PF: predicated region fallthrough
CT: control target
= control target key end

     0   :  { %12 = vsyncpa [#allocation3], 0  ;;  %s994_s0 = inlined_call_operand.vmem [shape: f32[2,4,256], index: 0, kind: input, shape index: {}]   ;;  %s995_s1 = inlined_call_operand.hbm [shape: f32[36,512], index: 1, kind: input, shape index: {}]   ;;  %s996_s2 = inlined_call_operand.vmem [shape: f32[8,36], index: 2, kind: input, shape index: {}]   ;;  %s997_s3 = inlined_call_operand.vmem [shape: f32[2,8], index: 3, kind: input, shape index: {}]   ;;  %s998_s4 = inlined_call_operand.vmem [shape: f32[2,1], index: 4, kind: input, shape index: {}]   ;;  %s999_s5 = inlined_call_operand.vmem [shape: f32[8,2], index: 5, kind: input, shape index: {}]   ;;  %s1000_s6 = inlined_call_operand.vmem [shape: f32[8,1], index: 6, kind: input, shape index: {}]   ;;  %s1001_s7 = inlined_call_operand.hbm [shape: f32[2,8,256], index: 7, kind: output, shape index: {}]  }
   0x1   :  { %13 = vsyncpa [#allocation4], 0  ;;  %s747_s24 = smov [#allocation2]   ;;  %s699_s28 = scalar_lea.hbm %s995_s1, 2560 }
   0x2   :  { %s21_s25 = sshll.u32 %s747_s24, 4  ;;  %p700_p0 = scmp.ne.s32.totalorder %s995_s1, %s699_s28  ;;  %s22_s25 = int_to_ptr.vmem [resolvable:$true] %s21_s25 }
   0x3   :  { %p703_p1 = scmp.lt.u32.totalorder %s699_s28, %s995_s1 }
   0x5   :  { %p705_p2 = pnand %p703_p1, %p700_p0 }
   0x7   :  { %708 = shalt.err (!%p705_p2)
}
   0x8   :  { %s709_s10 = scalar_lea.vmem %s22_s25, 2560  ;;  %p714_p4 = scmp.lt.s32.totalorder %s22_s25, %s22_s25 }
   0x9   :  { %p710_p3 = scmp.ne.s32.totalorder %s22_s25, %s709_s10  ;;  %p715_p5 = scmp.lt.s32.totalorder %s709_s10, %s709_s10 }
   0xb   :  { %p716_p6 = por %p715_p5, %p714_p4 }
   0xd   :  { %p717_p7 = pnand %p716_p6, %p710_p3 }
   0xf   :  { %720 = shalt.err (!%p717_p7)
}
  0x10   :  { %s748_s11 = smov 512   ;;  %s749_s12 = smov 32  }
  0x11   :  { %27 = dma.hbm_to_vmem [thread:$0]  %s995_s1, 2560, %s22_s25, [#allocation3], %s748_s11, %s748_s11, %s749_s12  }
  0x12   :  { %743 = dma.done.wait [#allocation3], 2560  }
  0x13   :  { %744 = vsyncadd [#allocation3], 4294964736  ;;  %v819_v0 = vld [vmem:[%s994_s0 + $0x8] sm:$0xff]  ;;  %v824_v1 = vld [vmem:[%s994_s0] sm:$0xff]  ;;  %s750_s19 = smov 16   ;;  %s751_s1 = smov 1   ;;  %v83_v11 = vlaneseq }
  0x14   :  { %94 = vrot.lane.b32.xlu1 %v819_v0, %s750_s19  ;;  %90 = vrot.lane.b32.xlu0 %v824_v1, %s750_s19  ;;  %v832_v2 = vcombine.high %v819_v0, %v819_v0  ;;  %v839_v3 = vcombine.high %v824_v1, %v824_v1  ;;  %s752_s0 = smov 17   ;;  %s753_s20 = smov 15   ;;  %v757_v4 = vmov 0.0   ;;  %vm229_vm3 = vcmask 1043456   ;;  %v47_v35 = vld [vmem:[#allocation2 + $0x8] sm:$0xff]  ;;  %v46_v42 = vld [vmem:[#allocation2] sm:$0xff] }
  0x15   :  { %s754_s21 = smov 127   ;;  %s755_s22 = smov 112   ;;  %346 = vmatprep.mubr.f32.mxu0 %v757_v4  ;;  %417 = vmatprep.mubr.f32.mxu1 %v757_v4  ;;  %v872_v14 = vand.u32 127, %v83_v11  ;;  %v51_v36 = vld [vmem:[#allocation2 + $0x28] sm:$0xff]  ;;  %v49_v48 = vld [vmem:[#allocation2 + $0x18] sm:$0xff]  ;;  %v48_v50 = vld [vmem:[#allocation2 + $0x10] sm:$0xff] }
  0x16   :  { %s756_s23 = smov 113   ;;  %s758_s24 = smov 111   ;;  %v50_v56 = vld [vmem:[#allocation2 + $0x20] sm:$0xff]  ;;  %v53_v58 = vld [vmem:[#allocation2 + $0x38] sm:$0xff]  ;;  %v52_v59 = vld [vmem:[#allocation2 + $0x30] sm:$0xff]  ;;  %vm266_vm9 = vcmask 293888  }
  0x17   :  { %vm98_vm0 = vcmp.lt.s32.totalorder %v872_v14, 16  ;;  %vm124_vm1 = vcmp.lt.s32.totalorder %v872_v14, 1  ;;  %vm85_vm2 = vcmp.lt.s32.totalorder %v872_v14, 17  ;;  %vm111_vm4 = vcmp.lt.s32.totalorder %v872_v14, 15 }
  0x18   :  { %96 = vrot.lane.b32.xlu1 %v832_v2, %s750_s19  ;;  %116 = vrot.lane.b32.xlu0 %v824_v1, %s751_s1  ;;  %vm137_vm5 = vcmp.lt.s32.totalorder %v872_v14, 127  ;;  %vm163_vm6 = vcmp.lt.s32.totalorder %v872_v14, 112  ;;  %vm150_vm7 = vcmp.lt.s32.totalorder %v872_v14, 113  ;;  %vm176_vm8 = vcmp.lt.s32.totalorder %v872_v14, 111 }
  0x19   :  { %vm759_vm10 = vmmov 0   ;;  %vm430_vm11 = vcmask 7168   ;;  %vm438_vm12 = vcmask 64512   ;;  %vm522_vm13 = vcmask 1041408  }
  0x1a   :  { %vm518_vm14 = vcmask 15360  }
  0x1c   :  { %118 = vrot.lane.b32.xlu1 %v839_v3, %s751_s1  ;;  %92 = vrot.lane.b32.xlu0 %v839_v3, %s750_s19 }
  0x20   :  { %122 = vrot.lane.b32.xlu1 %v832_v2, %s751_s1  ;;  %120 = vrot.lane.b32.xlu0 %v819_v0, %s751_s1 }
  0x24   :  { %77 = vrot.lane.b32.xlu1 %v839_v3, %s752_s0  ;;  %75 = vrot.lane.b32.xlu0 %v824_v1, %s752_s0 }
  0x28   :  { %81 = vrot.lane.b32.xlu1 %v832_v2, %s752_s0  ;;  %79 = vrot.lane.b32.xlu0 %v819_v0, %s752_s0 }
  0x2c   :  { %105 = vrot.lane.b32.xlu1 %v839_v3, %s753_s20  ;;  %103 = vrot.lane.b32.xlu0 %v824_v1, %s753_s20 }
  0x30   :  { %109 = vrot.lane.b32.xlu1 %v832_v2, %s753_s20  ;;  %107 = vrot.lane.b32.xlu0 %v819_v0, %s753_s20 }
  0x34   :  { %131 = vrot.lane.b32.xlu1 %v839_v3, %s754_s21  ;;  %129 = vrot.lane.b32.xlu0 %v824_v1, %s754_s21 }
  0x38   :  { %135 = vrot.lane.b32.xlu1 %v832_v2, %s754_s21  ;;  %133 = vrot.lane.b32.xlu0 %v819_v0, %s754_s21 }
  0x3c   :  { %157 = vrot.lane.b32.xlu1 %v839_v3, %s755_s22  ;;  %155 = vrot.lane.b32.xlu0 %v824_v1, %s755_s22 }
  0x40   :  { %161 = vrot.lane.b32.xlu1 %v832_v2, %s755_s22  ;;  %159 = vrot.lane.b32.xlu0 %v819_v0, %s755_s22 }
  0x44   :  { %144 = vrot.lane.b32.xlu1 %v839_v3, %s756_s23  ;;  %142 = vrot.lane.b32.xlu0 %v824_v1, %s756_s23 }
  0x48   :  { %148 = vrot.lane.b32.xlu1 %v832_v2, %s756_s23  ;;  %146 = vrot.lane.b32.xlu0 %v819_v0, %s756_s23 }
  0x4c   :  { %170 = vrot.lane.b32.xlu1 %v839_v3, %s758_s24  ;;  %168 = vrot.lane.b32.xlu0 %v824_v1, %s758_s24 }
  0x50   :  { %174 = vrot.lane.b32.xlu1 %v832_v2, %s758_s24  ;;  %172 = vrot.lane.b32.xlu0 %v819_v0, %s758_s24 }
  0x86   :  { %v95_v5 = vpop.permute.xlu1 %94  ;;  %v91_v6 = vpop.permute.xlu0 %90 }
  0x8a   :  { %v97_v7 = vpop.permute.xlu1 %96  ;;  %v117_v8 = vpop.permute.xlu0 %116 }
  0x8b   :  { %v99_v18 = vsel %vm98_vm0, %v95_v5, %v97_v7  ;;  %v102_v19 = vsel %vm98_vm0, %v97_v7, %v91_v6 }
  0x8c   :  { %v185_v26 = vrot.slane %v102_v19, 4  ;;  %v188_v27 = vrot.slane %v99_v18, 4 }
  0x8e   :  { %v119_v9 = vpop.permute.xlu1 %118  ;;  %v93_v10 = vpop.permute.xlu0 %92 }
  0x8f   :  { %v101_v17 = vsel %vm98_vm0, %v91_v6, %v93_v10  ;;  %v127_v20 = vsel %vm124_vm1, %v117_v8, %v119_v9  ;;  %v100_v29 = vsel %vm98_vm0, %v93_v10, %v95_v5 }
  0x90   :  { %v186_v24 = vrot.slane %v101_v17, 4  ;;  %v198_v28 = vrot.slane %v127_v20, 4  ;;  %v187_v43 = vrot.slane %v100_v29, 4 }
  0x92   :  { %v123_v12 = vpop.permute.xlu1 %122  ;;  %v121_v13 = vpop.permute.xlu0 %120 }
  0x93   :  { %v128_v30 = vsel %vm124_vm1, %v123_v12, %v117_v8  ;;  %v125_v31 = vsel %vm124_vm1, %v121_v13, %v123_v12  ;;  %v126_v38 = vsel %vm124_vm1, %v119_v9, %v121_v13 }
  0x94   :  { %v197_v45 = vrot.slane %v128_v30, 4  ;;  %v199_v51 = vrot.slane %v126_v38, 4  ;;  %v200_v52 = vrot.slane %v125_v31, 4 }
  0x96   :  { %v78_v15 = vpop.permute.xlu1 %77  ;;  %v76_v16 = vpop.permute.xlu0 %75 }
  0x97   :  { %v88_v23 = vsel %vm85_vm2, %v76_v16, %v78_v15 }
  0x98   :  { %v231_v37 = vsel %vm229_vm3, %v88_v23, %v186_v24 }
  0x99   :  { %v247_v46 = vmul.f32 %v231_v37, %v47_v35 }
  0x9a   :  { %v82_v21 = vpop.permute.xlu1 %81  ;;  %v80_v22 = vpop.permute.xlu0 %79 }
  0x9b   :  { %v89_v25 = vsel %vm85_vm2, %v82_v21, %v76_v16  ;;  %v86_v32 = vsel %vm85_vm2, %v80_v22, %v82_v21  ;;  %v87_v40 = vsel %vm85_vm2, %v78_v15, %v80_v22 }
  0x9c   :  { %v230_v39 = vsel %vm229_vm3, %v89_v25, %v185_v26  ;;  %v233_v49 = vsel %vm229_vm3, %v86_v32, %v188_v27  ;;  %v232_v53 = vsel %vm229_vm3, %v87_v40, %v187_v43 }
  0x9d   :  { %v246_v57 = vmul.f32 %v230_v39, %v46_v42  ;;  %v249_v8 = vmul.f32 %v233_v49, %v49_v48  ;;  %v248_v11 = vmul.f32 %v232_v53, %v48_v50  ;;  %v55_v42 = vld [vmem:[#allocation2 + $0x48] sm:$0xff]  ;;  %v56_v48 = vld [vmem:[#allocation2 + $0x50] sm:$0xff]  ;;  %v61_v53 = vld [vmem:[#allocation2 + $0x78] sm:$0xff] }
  0x9e   :  { %v106_v33 = vpop.permute.xlu1 %105  ;;  %v104_v34 = vpop.permute.xlu0 %103 }
  0x9f   :  { %v114_v41 = vsel %vm111_vm4, %v104_v34, %v106_v33 }
  0xa0   :  { %v235_v44 = vsel %vm229_vm3, %v114_v41, %v198_v28 }
  0xa1   :  { %v251_v47 = vmul.f32 %v235_v44, %v51_v36 }
  0xa2   :  { %v110_v54 = vpop.permute.xlu1 %109  ;;  %v108_v55 = vpop.permute.xlu0 %107 }
  0xa3   :  { %v115_v60 = vsel %vm111_vm4, %v110_v54, %v104_v34  ;;  %v112_v61 = vsel %vm111_vm4, %v108_v55, %v110_v54  ;;  %v113_v62 = vsel %vm111_vm4, %v106_v33, %v108_v55  ;;  %v660_v63 = vpack.c.bf16 %v251_v47, %v247_v46  ;;  %v58_v46 = vld [vmem:[#allocation2 + $0x60] sm:$0xff]  ;;  %v59_v55 = vld [vmem:[#allocation2 + $0x68] sm:$0xff] }
  0xa4   :  { %v234_v5 = vsel %vm229_vm3, %v115_v60, %v197_v45  ;;  %v236_v6 = vsel %vm229_vm3, %v113_v62, %v199_v51  ;;  %v237_v7 = vsel %vm229_vm3, %v112_v61, %v200_v52 }
  0xa5   :  { %661 = vmatprep.subr.bf16.mxu0 %v660_v63  ;;  %v250_v9 = vmul.f32 %v234_v5, %v50_v56  ;;  %v253_v10 = vmul.f32 %v237_v7, %v53_v58  ;;  %v252_v12 = vmul.f32 %v236_v6, %v52_v59  ;;  %v60_v56 = vld [vmem:[#allocation2 + $0x70] sm:$0xff]  ;;  %v54_v59 = vld [vmem:[#allocation2 + $0x40] sm:$0xff] }
  0xa6   :  { %v132_v13 = vpop.permute.xlu1 %131  ;;  %v130_v15 = vpop.permute.xlu0 %129 }
  0xa7   :  { %v662_v16 = vpack.c.bf16 %v250_v9, %v246_v57  ;;  %v668_v17 = vpack.c.bf16 %v253_v10, %v249_v8  ;;  %v670_v18 = vpack.c.bf16 %v252_v12, %v248_v11  ;;  %v140_v25 = vsel %vm137_vm5, %v130_v15, %v132_v13 }
  0xa8   :  { %v209_v32 = vrot.slane %v140_v25, 4 }
  0xa9   :  { %663 = vmatpush1.bf16.msra.mxu0 %v662_v16  ;;  %669 = vmatprep.subr.bf16.mxu1 %v668_v17  ;;  %v65_v17 = vld [vmem:[#allocation2 + $0x98] sm:$0xf] }
  0xaa   :  { %v136_v19 = vpop.permute.xlu1 %135  ;;  %v134_v20 = vpop.permute.xlu0 %133  ;;  %671 = vmatpush1.bf16.msra.mxu1 %v670_v18  ;;  %v238_v44 = vsel %vm229_vm3, %v824_v1, %v209_v32  ;;  %v63_v18 = vld [vmem:[#allocation2 + $0x88] sm:$0xf] }
  0xab   :  { %v139_v23 = vsel %vm137_vm5, %v132_v13, %v134_v20  ;;  %v141_v24 = vsel %vm137_vm5, %v136_v19, %v130_v15  ;;  %v138_v26 = vsel %vm137_vm5, %v134_v20, %v136_v19  ;;  %v254_v11 = vmul.f32 %v238_v44, %v54_v59  ;;  %v64_v19 = vld [vmem:[#allocation2 + $0x90] sm:$0xf]  ;;  %v62_v20 = vld [vmem:[#allocation2 + $0x80] sm:$0xf] }
  0xac   :  { %v210_v27 = vrot.slane %v139_v23, 4  ;;  %v212_v31 = vrot.slane %v141_v24, 4  ;;  %v211_v33 = vrot.slane %v138_v26, 4 }
  0xae   :  { %v158_v21 = vpop.permute.xlu1 %157  ;;  %v156_v22 = vpop.permute.xlu0 %155  ;;  %v239_v34 = vsel %vm229_vm3, %v839_v3, %v210_v27  ;;  %v241_v43 = vsel %vm229_vm3, %v832_v2, %v212_v31  ;;  %v57_v3 = vld [vmem:[#allocation2 + $0x58] sm:$0xff]  ;;  %v240_v45 = vsel %vm229_vm3, %v819_v0, %v211_v33  ;;  %v41_v31 = vld [vmem:[%s996_s2] sm:$0xff] }
  0xaf   :  { %v166_v30 = vsel %vm163_vm6, %v156_v22, %v158_v21  ;;  %v255_v2 = vmul.f32 %v239_v34, %v55_v42  ;;  %v257_v58 = vmul.f32 %v241_v43, %v57_v3  ;;  %v256_v8 = vmul.f32 %v240_v45, %v56_v48  ;;  %v42_v43 = vld [vmem:[%s997_s3] sm:$0x3]  ;;  %s762_s3 = smov [#allocation5]  }
  0xb0   :  { %v221_v35 = vrot.slane %v166_v30, 4  ;;  %v44_v48 = vld [vmem:[%s999_s5] sm:$0xff]  ;;  %s624_s5 = sshll.u32 %s762_s3, 4  ;;  %s625_s5 = int_to_ptr.vmem [resolvable:$true] %s624_s5 }
  0xb1   :  { %p726_p9 = scmp.lt.s32.totalorder %s625_s5, %s625_s5 }
  0xb2   :  { %v162_v28 = vpop.permute.xlu1 %161  ;;  %v160_v29 = vpop.permute.xlu0 %159 }
  0xb3   :  { %v167_v38 = vsel %vm163_vm6, %v162_v28, %v156_v22  ;;  %v164_v39 = vsel %vm163_vm6, %v160_v29, %v162_v28  ;;  %v165_v40 = vsel %vm163_vm6, %v158_v21, %v160_v29 }
  0xb4   :  { %v224_v49 = vrot.slane %v167_v38, 4  ;;  %v222_v50 = vrot.slane %v165_v40, 4  ;;  %v223_v51 = vrot.slane %v164_v39, 4  ;;  %v43_v38 = vld [vmem:[%s998_s4] sm:$0x3] }
  0xb6   :  { %v145_v36 = vpop.permute.xlu1 %144  ;;  %v143_v37 = vpop.permute.xlu0 %142 }
  0xb7   :  { %v153_v41 = vsel %vm150_vm7, %v143_v37, %v145_v36 }
  0xb8   :  { %v242_v47 = vsel %vm229_vm3, %v153_v41, %v221_v35 }
  0xb9   :  { %v258_v60 = vmul.f32 %v242_v47, %v58_v46 }
  0xba   :  { %v149_v52 = vpop.permute.xlu1 %148  ;;  %v147_v54 = vpop.permute.xlu0 %146 }
  0xbb   :  { %v154_v57 = vsel %vm150_vm7, %v149_v52, %v143_v37  ;;  %v151_v1 = vsel %vm150_vm7, %v147_v54, %v149_v52  ;;  %v152_v0 = vsel %vm150_vm7, %v145_v36, %v147_v54  ;;  %v666_v16 = vpack.c.bf16 %v258_v60, %v254_v11 }
  0xbc   :  { %v245_v61 = vsel %vm229_vm3, %v154_v57, %v224_v49  ;;  %v243_v62 = vsel %vm229_vm3, %v152_v0, %v222_v50  ;;  %v244_v63 = vsel %vm229_vm3, %v151_v1, %v223_v51  ;;  %v760_v37 = vmov 0  }
  0xbd   :  { %v261_v5 = vmul.f32 %v245_v61, %v61_v53  ;;  %v259_v6 = vmul.f32 %v243_v62, %v59_v55  ;;  %v260_v7 = vmul.f32 %v244_v63, %v60_v56  ;;  %693 = vset.pattern.permute.xlu0 %v760_v37  ;;  %694 = vset.pattern.permute.xlu1 %v760_v37  ;;  %v761_v49 = vmov 1  }
  0xbe   :  { %v171_v9 = vpop.permute.xlu1 %170  ;;  %v169_v10 = vpop.permute.xlu0 %168 }
  0xbf   :  { %v664_v12 = vpack.c.bf16 %v259_v6, %v255_v2  ;;  %v672_v13 = vpack.c.bf16 %v261_v5, %v257_v58  ;;  %v674_v15 = vpack.c.bf16 %v260_v7, %v256_v8  ;;  %v179_v21 = vsel %vm176_vm8, %v169_v10, %v171_v9 }
  0xc0   :  { %v262_v30 = vmul.f32 %v179_v21, %v62_v20 }
  0xc1   :  { %665 = vmatprep.subr.bf16.mxu0 %v664_v12  ;;  %673 = vmatprep.subr.bf16.mxu1 %v672_v13 }
  0xc2   :  { %v175_v22 = vpop.permute.xlu1 %174  ;;  %v173_v23 = vpop.permute.xlu0 %172  ;;  %667 = vmatpush1.bf16.msra.mxu0 %v666_v16  ;;  %675 = vmatpush1.bf16.msra.mxu1 %v674_v15 }
  0xc3   :  { %v180_v24 = vsel %vm176_vm8, %v175_v22, %v169_v10  ;;  %v177_v25 = vsel %vm176_vm8, %v173_v23, %v175_v22  ;;  %v178_v26 = vsel %vm176_vm8, %v171_v9, %v173_v23 }
  0xc4   :  { %v265_v27 = vmul.f32 %v180_v24, %v65_v17  ;;  %v263_v28 = vmul.f32 %v178_v26, %v63_v18  ;;  %v264_v29 = vmul.f32 %v177_v25, %v64_v19 }
  0xc6   :  { %637 = vmatprep.subr.msk.mxu0 %vm229_vm3, %v263_v28  ;;  %640 = vmatprep.subr.msk.mxu1 %vm229_vm3, %v265_v27 }
  0xc7   :  { %638 = vmatpush1.msk.msra.mxu0 %vm229_vm3, %v262_v30  ;;  %641 = vmatpush1.msk.msra.mxu1 %vm229_vm3, %v264_v29 }
  0xc8   :  { %639 = vmatmul.mubr.msk.f32.vlgmr.msra.gmra.mrb[0].mxu0 %vm266_vm9, %v41_v31  ;;  %642 = vmatmul.mubr.msk.f32.vlgmr.msra.gmra.mrb[0].mxu1 %vm266_vm9, %v41_v31 }
  0xc9   :  { %650 = vmatprep.subr.mxu0 %v757_v4  ;;  %655 = vmatprep.subr.mxu1 %v757_v4 }
  0xca   :  { %652 = vmatprep.mubr.msk.f32.mxu0 %vm759_vm10, %v757_v4  ;;  %657 = vmatprep.mubr.msk.f32.mxu1 %vm759_vm10, %v757_v4  ;;  %v45_v4 = vld [vmem:[%s1000_s6] sm:$0xff]  ;;  %s721_s6 = scalar_lea.vmem %s625_s5, 512 }
  0xcb   :  { %p722_p8 = scmp.ne.s32.totalorder %s625_s5, %s721_s6  ;;  %p727_p10 = scmp.lt.s32.totalorder %s721_s6, %s721_s6 }
  0xcd   :  { %p728_p11 = por %p727_p10, %p726_p9 }
  0xcf   :  { %p729_p12 = pnand %p728_p11, %p722_p8 }
 0x19b   :  { %v348_v14 = vpop.f32.mrb[0].mxu0  ;;  %v419_v32 = vpop.f32.mrb[0].mxu1 }
 0x19c   :  { %v350_v33 = vpop.f32.mrb[1].mxu0  ;;  %v421_v34 = vpop.f32.mrb[1].mxu1 }
 0x19d   :  { %v427_v35 = vadd.f32 %v421_v34, %v419_v32  ;;  %v424_v36 = vadd.f32 %v350_v33, %v348_v14 }
 0x19f   :  { %428 = vadd.xlane.f32.xlu1 %v427_v35  ;;  %425 = vadd.xlane.f32.xlu0 %v424_v36 }
 0x1b0   :  { %515 = vperm.xlu1 %694, %v45_v4  }
 0x1b5   :  { %435 = vperm.xlu0 %693, %v43_v38  }
 0x1b9   :  { %696 = vset.pattern.permute.xlu0 %v761_v49 }
 0x22c   :  { %v429_v39 = vpop.xlane.xlu1 %428  ;;  %v426_v40 = vpop.xlane.xlu0 %425 }
 0x22d   :  { %v431_v41 = vsel %vm430_vm11, %v426_v40, %v429_v39 }
 0x22e   :  { %v432_v42 = vmul.f32 0.00390625, %v431_v41 }
 0x230   :  { %651 = vmatpush3.msra.mxu0 %v432_v42  ;;  %v516_v50 = vpop.permute.xlu1 %515 }
 0x231   :  { %653 = vmatmul.mubr.msk.f32.vlgmr.msra.gmra.mrb[2].mxu0 %vm438_vm12, %v42_v43 }
 0x234   :  { %v436_v3 = vpop.permute.xlu0 %435 }
 0x304   :  { %v508_v44 = vpop.f32.mrb[2].mxu0 }
 0x305   :  { %v509_v45 = vadd.f32 %v508_v44, %v436_v3  ;;  %v654_v46 = vpop.f32.mrb[3].mxu0 }
 0x307   :  { %v512_v47 = vmax.f32 %v509_v45, 0.0 }
 0x309   :  { %656 = vmatpush3.msk.msra.mxu1 %vm522_vm13, %v512_v47 }
 0x30a   :  { %658 = vmatmul.mubr.msk.f32.vlgmr.msra.gmra.mrb[2].mxu1 %vm518_vm14, %v44_v48 }
 0x3dd   :  { %v592_v51 = vpop.f32.mrb[2].mxu1 }
 0x3de   :  { %v593_v52 = vadd.f32 %v592_v51, %v516_v50  ;;  %v659_v53 = vpop.f32.mrb[3].mxu1 }
 0x3e0   :  { %v596_v54 = vmul.f32 0.16666667, %v593_v52 }
 0x3e2   :  { %v597_v55 = vadd.f32 0.5, %v596_v54 }
 0x3e4   :  { %v598_v56 = vmax.f32 %v597_v55, 0.0 }
 0x3e6   :  { %v599_v2 = vmin.f32 %v598_v56, 1.0 }
 0x3e8   :  { %v600_v57 = vadd.f32 1.0, %v599_v2 }
 0x3ea   :  { %603 = vperm.xlu1 %694, %v600_v57  }
 0x3ee   :  { %695 = vset.pattern.permute.xlu1 %v761_v49 }
 0x3ef   :  { %611 = vperm.xlu1 %695, %v600_v57  }
 0x469   :  { %v604_v1 = vpop.permute.xlu1 %603 }
 0x46a   :  { %v606_v0 = vmul.f32 %v604_v1, %v348_v14  ;;  %v607_v58 = vmul.f32 %v604_v1, %v350_v33 }
 0x46c   :  { %608 = vst [vmem:[#allocation5] sm:$0xff] %v606_v0  ;;  %609 = vst [vmem:[#allocation5 + $0x8] sm:$0xff] %v607_v58 }
 0x46e   :  { %v612_v59 = vpop.permute.xlu1 %611 }
 0x46f   :  { %v614_v60 = vmul.f32 %v612_v59, %v419_v32  ;;  %v615_v61 = vmul.f32 %v612_v59, %v421_v34 }
 0x471   :  { %617 = vst [vmem:[#allocation5 + $0x10] sm:$0xff] %v614_v60  ;;  %618 = vst [vmem:[#allocation5 + $0x18] sm:$0xff] %v615_v61 }
 0x472   :  { %732 = shalt.err (!%p729_p12)
}
 0x473   :  { %s733_s12 = scalar_lea.hbm %s1001_s7, 512 }
 0x474   :  { %p734_p13 = scmp.ne.s32.totalorder %s1001_s7, %s733_s12  ;;  %p737_p0 = scmp.lt.u32.totalorder %s733_s12, %s1001_s7 }
 0x476   :  { %p739_p1 = pnand %p737_p0, %p734_p13 }
 0x478   :  { %742 = shalt.err (!%p739_p1)
}
 0x479   :  { %s763_s17 = smov 256  }
 0x47a   :  { %630 = dma.vmem_to_hbm [thread:$0]  %s625_s5, 512, %s1001_s7, [#allocation4], %s763_s17, %s763_s17, %s750_s19  }
 0x47b   :  { %745 = dma.done.wait [#allocation4], 512  }
 0x47c   :  { %746 = vsyncadd [#allocation4], 4294966784 }
 0x47d   :  { %634 = vsyncpa [#allocation3], 1 }
 0x47e   :  { %635 = vsyncpa [#allocation4], 1 }

</bundles_post_ra>
